<compile_context>
chip_gen: v7x
topology: tpu7x:2x2x1
jax: 0.10.0
libtpu: 0.0.40
codegen_flags: <defaults>
</compile_context>

<pallas_src>
import functools
import math

import jax
import jax.numpy as jnp
from jax.experimental import pallas as pl
from jax.experimental.pallas import tpu as pltpu


def _round_up(x, m):
    return ((x + m - 1) // m) * m


# ----------------------------------------------------------------------------
# Pallas kernels
# ----------------------------------------------------------------------------
def _fused_matmul_bias_kernel(x_ref, w_ref, b_ref, *rest, has_res, relu):
    """GEMM (bf16 MXU, f32 acc) + BN shift + optional residual add + optional ReLU."""
    if has_res:
        res_ref, o_ref = rest
    else:
        (o_ref,) = rest
    acc = jnp.dot(x_ref[...], w_ref[...], preferred_element_type=jnp.float32)
    y = acc + b_ref[...]                       # BN scale already folded into w
    if has_res:
        y = y + res_ref[...].astype(jnp.float32)
    if relu:
        y = jnp.maximum(y, 0.0)
    o_ref[...] = y.astype(o_ref.dtype)


def fused_matmul_bias(x, w, shift, residual=None, relu=True):
    """x: [M, K] bf16, w: [K, N] bf16 (BN scale pre-folded), shift: [N] f32.

    Returns relu?((x @ w) + shift (+ residual)) as bf16 [M, N].
    Tiled (tm rows) x (tn cols); both grid axes "parallel".
    """
    M, K = x.shape
    Kw, N = w.shape
    assert K == Kw
    tm = min(512, _round_up(max(M, 1), 128))   # 128-aligned row tile, up to 512
    tn = min(N, 512)                           # split N=1024 into two 512-lane tiles
    Mp = _round_up(M, tm)
    if Mp != M:
        x = jnp.pad(x, ((0, Mp - M), (0, 0)))
    shift2 = shift.reshape(1, N).astype(jnp.float32)

    inputs = [x, w, shift2]
    in_specs = [
        pl.BlockSpec((tm, K), lambda i, j: (i, 0)),
        pl.BlockSpec((K, tn), lambda i, j: (0, j)),
        pl.BlockSpec((1, tn), lambda i, j: (0, j)),
    ]
    has_res = residual is not None
    if has_res:
        r = residual
        if Mp != M:
            r = jnp.pad(r, ((0, Mp - M), (0, 0)))
        inputs.append(r)
        in_specs.append(pl.BlockSpec((tm, tn), lambda i, j: (i, j)))

    kernel = functools.partial(_fused_matmul_bias_kernel, has_res=has_res, relu=relu)
    out = pl.pallas_call(
        kernel,
        out_shape=jax.ShapeDtypeStruct((Mp, N), jnp.bfloat16),
        grid=(Mp // tm, N // tn),
        in_specs=in_specs,
        out_specs=pl.BlockSpec((tm, tn), lambda i, j: (i, j)),
        compiler_params=pltpu.CompilerParams(
            dimension_semantics=("parallel", "parallel"),
            vmem_limit_bytes=48 * 1024 * 1024),
    )(*inputs)
    if Mp != M:
        out = out[:M]   # TODO(synk): carry padded rows through a whole stage to drop this crop
    return out


def _maxpool_kernel(p_ref, o_ref):
    # p_ref: [tm, 9, C] window patches -> max over the 9 window positions.
    o_ref[...] = jnp.max(p_ref[...], axis=1)


def maxpool2d_3x3_s2_p1(x):
    """x: NHWC -> NHWC, kernel 3, stride 2, padding 1 (matches nn.MaxPool2d(3,2,1))."""
    N, H, W, C = x.shape
    OH = (H + 2 - 3) // 2 + 1
    OW = (W + 2 - 3) // 2 + 1
    neg = jnp.asarray(-jnp.inf, x.dtype)
    xp = jnp.pad(x, ((0, 0), (1, 1), (1, 1), (0, 0)), constant_values=neg)
    cols = []
    for i in range(3):
        for j in range(3):
            cols.append(xp[:, i:i + 2 * (OH - 1) + 1:2, j:j + 2 * (OW - 1) + 1:2, :])
    patches = jnp.stack(cols, axis=3).reshape(N * OH * OW, 9, C)

    M = N * OH * OW
    tm = min(512, _round_up(M, 8))
    Mp = _round_up(M, tm)
    if Mp != M:
        patches = jnp.pad(patches, ((0, Mp - M), (0, 0), (0, 0)))
    out = pl.pallas_call(
        _maxpool_kernel,
        out_shape=jax.ShapeDtypeStruct((Mp, C), x.dtype),
        grid=(Mp // tm,),
        in_specs=[pl.BlockSpec((tm, 9, C), lambda i: (i, 0, 0))],
        out_specs=pl.BlockSpec((tm, C), lambda i: (i, 0)),
        compiler_params=pltpu.CompilerParams(dimension_semantics=("parallel",)),
    )(patches)
    if Mp != M:
        out = out[:M]
    return out.reshape(N, OH, OW, C)


# ----------------------------------------------------------------------------
# Glue: im2col + conv/bn helper (plain-JAX data movement, Pallas compute)
# ----------------------------------------------------------------------------
def im2col(x, kh, kw, stride, pad):
    """x: NHWC (bf16) -> ([N*OH*OW, kh*kw*C], (N, OH, OW)); K ordered (kh, kw, cin)."""
    N, H, W, C = x.shape
    OH = (H + 2 * pad - kh) // stride + 1
    OW = (W + 2 * pad - kw) // stride + 1
    xp = jnp.pad(x, ((0, 0), (pad, pad), (pad, pad), (0, 0))) if pad > 0 else x
    cols = []
    for i in range(kh):
        for j in range(kw):
            cols.append(
                xp[:, i:i + stride * (OH - 1) + 1:stride,
                      j:j + stride * (OW - 1) + 1:stride, :])
    patches = jnp.stack(cols, axis=3)          # [N, OH, OW, kh*kw, C] (bf16)
    return patches.reshape(N * OH * OW, kh * kw * C), (N, OH, OW)


def conv_bn(x, w, shift, ksize, stride, pad, relu=True, residual=None):
    """x: NHWC bf16; w: [K, Cout] bf16 with BN scale folded in; shift: [Cout] f32."""
    if ksize == 1:
        assert pad == 0
        if stride > 1:
            x = x[:, ::stride, ::stride, :]    # 1x1 stride-s conv == strided subsample
        n, oh, ow, c = x.shape
        patches = x.reshape(n * oh * ow, c)    # no im2col needed for 1x1
    else:
        patches, (n, oh, ow) = im2col(x, ksize, ksize, stride, pad)
    res_flat = residual.reshape(n * oh * ow, -1) if residual is not None else None
    out = fused_matmul_bias(patches, w, shift, residual=res_flat, relu=relu)
    return out.reshape(n, oh, ow, -1)


# ----------------------------------------------------------------------------
# Deterministic parameter construction (ResNet-50 stem + layer1..layer3)
# BN (eval mode) scale is folded into the conv weights; only the shift remains.
# ----------------------------------------------------------------------------
def make_conv_w(key, cin, cout, k):
    fan = cin * k * k
    w = jax.random.normal(key, (k, k, cin, cout), jnp.float32) / math.sqrt(fan)
    return w.reshape(k * k * cin, cout)        # [K, Cout], K ordered (kh, kw, cin)


def make_bn(key, n, eps=1e-5):
    k1, k2, k3, k4 = jax.random.split(key, 4)
    gamma = 1.0 + 0.1 * jax.random.normal(k1, (n,), jnp.float32)
    beta = 0.1 * jax.random.normal(k2, (n,), jnp.float32)
    mean = 0.1 * jax.random.normal(k3, (n,), jnp.float32)
    var = 1.0 + 0.1 * jax.random.uniform(k4, (n,), jnp.float32)
    scale = gamma / jnp.sqrt(var + eps)
    shift = beta - mean * scale
    return scale, shift


def fold(w, scale):
    """Fold eval-mode BN scale into conv weights; cast to bf16 for the MXU."""
    return (w * scale[None, :]).astype(jnp.bfloat16)


def make_bottleneck(key, inplanes, planes, stride, downsample):
    ks = jax.random.split(key, 8)
    s1, b1 = make_bn(ks[1], planes)
    s2, b2 = make_bn(ks[3], planes)
    s3, b3 = make_bn(ks[5], planes * 4)
    p = {
        "w1": fold(make_conv_w(ks[0], inplanes, planes, 1), s1), "b1": b1,
        "w2": fold(make_conv_w(ks[2], planes, planes, 3), s2),   "b2": b2,
        "w3": fold(make_conv_w(ks[4], planes, planes * 4, 1), s3), "b3": b3,
        "stride": stride, "downsample": downsample,
    }
    if downsample:
        sd, bd = make_bn(ks[7], planes * 4)
        p["wd"] = fold(make_conv_w(ks[6], inplanes, planes * 4, 1), sd)
        p["bd"] = bd
    return p


def make_layer(key, inplanes, planes, n_blocks, stride):
    keys = jax.random.split(key, n_blocks)
    blocks = [make_bottleneck(keys[0], inplanes, planes, stride, True)]
    for i in range(1, n_blocks):
        blocks.append(make_bottleneck(keys[i], planes * 4, planes, 1, False))
    return blocks


def make_encoder_params(key):
    ks = jax.random.split(key, 7)
    # conv1 (3->64), conv1_m (1->64), conv1_o (1->64): their sum on [f, m, o] equals
    # a single 7x7 conv on the channel-concatenated (C=5) input, with the weights
    # interleaved into the (kh, kw, cin=5) layout im2col produces.
    w_f = make_conv_w(ks[0], 3, 64, 7).reshape(49, 3, 64)
    w_m = make_conv_w(ks[1], 1, 64, 7).reshape(49, 1, 64)
    w_o = make_conv_w(ks[2], 1, 64, 7).reshape(49, 1, 64)
    w_stem = jnp.concatenate([w_f, w_m, w_o], axis=1).reshape(49 * 5, 64)
    s1, b1 = make_bn(ks[3], 64)
    return {
        "w_stem": fold(w_stem, s1), "b_stem": b1,
        "layer1": make_layer(ks[4], 64, 64, 3, 1),     # res2 -> 256 ch
        "layer2": make_layer(ks[5], 256, 128, 4, 2),   # res3 -> 512 ch
        "layer3": make_layer(ks[6], 512, 256, 6, 2),   # res4 -> 1024 ch
    }


# ----------------------------------------------------------------------------
# Forward pass
# ----------------------------------------------------------------------------
def bottleneck_forward(x, p):
    identity = x
    out = conv_bn(x, p["w1"], p["b1"], 1, 1, 0, relu=True)
    out = conv_bn(out, p["w2"], p["b2"], 3, p["stride"], 1, relu=True)
    if p["downsample"]:
        identity = conv_bn(x, p["wd"], p["bd"], 1, p["stride"], 0, relu=False)
    # conv3 + bn3 + residual add + relu fused in one Pallas call
    out = conv_bn(out, p["w3"], p["b3"], 1, 1, 0, relu=True, residual=identity)
    return out


def encoder_m_forward(params, in_f, in_m, in_o):
    """in_f: [N,3,H,W], in_m/in_o: [N,1,H,W] (NCHW, like the PyTorch module).
    Returns (r4, r1) in NCHW (float32)."""
    mean = jnp.array([0.485, 0.456, 0.406], jnp.float32).reshape(1, 3, 1, 1)
    std = jnp.array([0.229, 0.224, 0.225], jnp.float32).reshape(1, 3, 1, 1)
    f = (in_f - mean) / std                                 # cheap preprocessing glue

    # Concatenate f(3) + m(1) + o(1) along channels, NCHW -> NHWC, cast to bf16 once.
    x5 = jnp.concatenate([f, in_m, in_o], axis=1)
    x5 = jnp.transpose(x5, (0, 2, 3, 1)).astype(jnp.bfloat16)

    # Stem: one im2col + one fused GEMM replaces conv1(f)+conv1_m(m)+conv1_o(o)+bn1+relu.
    patches, (n, oh, ow) = im2col(x5, 7, 7, 2, 3)
    r1 = fused_matmul_bias(patches, params["w_stem"], params["b_stem"], relu=True)
    r1 = r1.reshape(n, oh, ow, 64)

    x = maxpool2d_3x3_s2_p1(r1)
    for blk in params["layer1"]:
        x = bottleneck_forward(x, blk)  # r2
    for blk in params["layer2"]:
        x = bottleneck_forward(x, blk)  # r3
    for blk in params["layer3"]:
        x = bottleneck_forward(x, blk)  # r4
    r4 = x

    # NHWC -> NCHW, f32 at the module boundary to match the PyTorch return convention.
    r4 = jnp.transpose(r4, (0, 3, 1, 2)).astype(jnp.float32)
    r1 = jnp.transpose(r1, (0, 3, 1, 2)).astype(jnp.float32)
    return r4, r1


# ----------------------------------------------------------------------------
if __name__ == "__main__":
    key = jax.random.PRNGKey(0)
    kp, kf, km, ko = jax.random.split(key, 4)

    params = make_encoder_params(kp)

    # Small shapes consistent with the module: batch=2, 16x16 frames.
    in_f = jax.random.normal(kf, (2, 3, 16, 16), jnp.float32)
    in_m = jax.random.uniform(km, (2, 1, 16, 16), jnp.float32)
    in_o = jax.random.uniform(ko, (2, 1, 16, 16), jnp.float32)

    r4, r1 = encoder_m_forward(params, in_f, in_m, in_o)
    jax.block_until_ready((r4, r1))

    assert r1.shape == (2, 64, 8, 8), r1.shape      # stem output (after bn+relu)
    assert r4.shape == (2, 1024, 1, 1), r4.shape    # layer3 / res4 output
    assert jnp.all(jnp.isfinite(r4)) and jnp.all(jnp.isfinite(r1))

    print("KERNEL_OK")
</pallas_src>

<mosaic_0001>
module attributes {stable_mosaic.version = 11 : i64} {
  func.func @_fused_matmul_bias_kernel(%arg0: i32, %arg1: i32, %arg2: memref<128x245xbf16, #tpu.memory_space<vmem>>, %arg3: memref<245x64xbf16, #tpu.memory_space<vmem>>, %arg4: memref<1x64xf32, #tpu.memory_space<vmem>>, %arg5: memref<128x64xbf16, #tpu.memory_space<vmem>>) attributes {dimension_semantics = [#tpu.dimension_semantics<parallel>, #tpu.dimension_semantics<parallel>], iteration_bounds = array<i64: 1, 1>, scalar_prefetch = 0 : i64, scratch_operands = 0 : i64, tpu.core_type = #tpu.core_type<tc>, window_params = [{transform_indices = @transform_0, window_bounds = array<i64: 128, 245>}, {transform_indices = @transform_1, window_bounds = array<i64: 245, 64>}, {transform_indices = @transform_2, window_bounds = array<i64: 1, 64>}, {transform_indices = @transform_3, window_bounds = array<i64: 128, 64>}]} {
    %c0 = arith.constant 0 : index
    %c0_0 = arith.constant 0 : index
    %0 = vector.load %arg2[%c0, %c0_0] : memref<128x245xbf16, #tpu.memory_space<vmem>>, vector<128x245xbf16>
    %c0_1 = arith.constant 0 : index
    %c0_2 = arith.constant 0 : index
    %1 = vector.load %arg3[%c0_1, %c0_2] : memref<245x64xbf16, #tpu.memory_space<vmem>>, vector<245x64xbf16>
    %cst = arith.constant dense<0.000000e+00> : vector<128x64xf32>
    %2 = tpu.matmul %0, %1, %cst {dimension_numbers = #tpu.dot_dimension_numbers<[1], [0], [0], [1], [0, 0, 1, 1], [], []>} : vector<128x245xbf16>, vector<245x64xbf16>, vector<128x64xf32> -> vector<128x64xf32>
    %c0_3 = arith.constant 0 : index
    %c0_4 = arith.constant 0 : index
    %3 = vector.load %arg4[%c0_3, %c0_4] : memref<1x64xf32, #tpu.memory_space<vmem>>, vector<1x64xf32>
    %4 = vector.broadcast %3 : vector<1x64xf32> to vector<128x64xf32>
    %5 = arith.addf %2, %4 : vector<128x64xf32>
    %cst_5 = arith.constant 0.000000e+00 : f32
    %6 = vector.broadcast %cst_5 : f32 to vector<128x64xf32>
    %7 = arith.maximumf %5, %6 : vector<128x64xf32>
    %8 = arith.truncf %7 : vector<128x64xf32> to vector<128x64xbf16>
    %c0_6 = arith.constant 0 : index
    %c0_7 = arith.constant 0 : index
    %9 = vector.load %arg5[%c0_6, %c0_7] : memref<128x64xbf16, #tpu.memory_space<vmem>>, vector<128x64xbf16>
    tpu.vector_store %arg5[%c0_6, %c0_7], %8 {strides = array<i32>} : memref<128x64xbf16, #tpu.memory_space<vmem>>, vector<128x64xbf16>,
    return
  }
  func.func @transform_0(%arg0: i32, %arg1: i32) -> (i32, i32) {
    %c0_i32 = arith.constant 0 : i32
    %c0_i32_0 = arith.constant 0 : i32
    return %arg0, %c0_i32 : i32, i32
  }
  func.func @transform_1(%arg0: i32, %arg1: i32) -> (i32, i32) {
    %c0_i32 = arith.constant 0 : i32
    %c0_i32_0 = arith.constant 0 : i32
    return %c0_i32, %arg1 : i32, i32
  }
  func.func @transform_2(%arg0: i32, %arg1: i32) -> (i32, i32) {
    %c0_i32 = arith.constant 0 : i32
    %c0_i32_0 = arith.constant 0 : i32
    return %c0_i32, %arg1 : i32, i32
  }
  func.func @transform_3(%arg0: i32, %arg1: i32) -> (i32, i32) {
    %c0_i32 = arith.constant 0 : i32
    return %arg0, %arg1 : i32, i32
  }
}

</mosaic_0001>

<bundles_post_ra>
// kernel: tpu_custom_call.1
= control target key start
LH: loop header
LB: loop body
LE: loop exit
PB: predicated region body
PF: predicated region fallthrough
CT: control target
= control target key end

     0   :  { %vm259_vm0 = vcmask 1041408   ;;  %vm234_vm1 = vcmask 957440   ;;  %vm260_vm2 = vcmask 1042432   ;;  %v658_v12 = vmov 65535   ;;  %s868_s1 = inlined_call_operand.vmem [shape: bf16[245,64], index: 1, kind: input, shape index: {}]   ;;  %s869_s0 = inlined_call_operand.vmem [shape: bf16[128,245], index: 0, kind: input, shape index: {}]   ;;  %s870_s2 = inlined_call_operand.vmem [shape: f32[1,64], index: 2, kind: input, shape index: {}]   ;;  %s871_s3 = inlined_call_operand.vmem [shape: bf16[128,64], index: 3, kind: output, shape index: {}]  }
   0x1   :  { %v618_v0 = vld [vmem:[%s868_s1 + $0x40] sm:$0xff]   ;;  %v620_v2 = vld [vmem:[%s868_s1 + $0x48] sm:$0xff]   ;;  %v622_v4 = vld [vmem:[%s868_s1 + $0x50] sm:$0xff]   ;;  %v261_v13 = vsel %vm259_vm0, 4294967295, %v658_v12  ;;  %vm443_vm3 = vcmask 519168  }
   0x2   :  { %v619_v1 = vld [vmem:[%s868_s1] sm:$0xff]   ;;  %537 = vmatprep.subr.bf16.mxu0 %v618_v0  ;;  %601 = vmatprep.subr.bf16.mxu1 %v618_v0  ;;  %v621_v3 = vld [vmem:[%s868_s1 + $0x8] sm:$0xff]   ;;  %v623_v5 = vld [vmem:[%s868_s1 + $0x10] sm:$0xff]   ;;  %v262_v18 = vsel %vm260_vm2, %v261_v13, 0 }
   0x3   :  { %538 = vmatpush3.bf16.msra.mxu0 %v619_v1  ;;  %609 = vmatpush3.bf16.msra.mxu1 %v619_v1  ;;  %v624_v6 = vld [vmem:[%s868_s1 + $0x58] sm:$0xff]   ;;  %v626_v8 = vld [vmem:[%s868_s1 + $0x60] sm:$0xff]   ;;  %v628_v10 = vld [vmem:[%s868_s1 + $0x68] sm:$0xff]  }
   0x4   :  { %539 = vmatprep.subr.bf16.mxu0 %v620_v2  ;;  %602 = vmatprep.subr.bf16.mxu1 %v620_v2  ;;  %v625_v7 = vld [vmem:[%s868_s1 + $0x18] sm:$0xff]   ;;  %v627_v9 = vld [vmem:[%s868_s1 + $0x20] sm:$0xff]   ;;  %v629_v15 = vld [vmem:[%s868_s1 + $0x28] sm:$0xff]  }
   0x5   :  { %v636_v11 = vld [vmem:[%s869_s0 + $0x4] ss:$8 sps:$4 sm:$0xff]   ;;  %v630_v16 = vld [vmem:[%s868_s1 + $0x70] sm:$0xff]   ;;  %v632_v17 = vld [vmem:[%s868_s1 + $0x78] ss:$0 sps:$4 sm:$0x77]  }
   0x6   :  { %497 = vmatprep.mubr.msk.bf16.mxu0 %vm234_vm1, %v636_v11  ;;  %v639_v14 = vld [vmem:[%s869_s0 + $0x44] ss:$8 sps:$4 sm:$0xff]   ;;  %v631_v19 = vld [vmem:[%s868_s1 + $0x30] sm:$0xff]   ;;  %v264_v20 = vand.u32 %v632_v17, %v262_v18  ;;  %v633_v21 = vld [vmem:[%s868_s1 + $0x38] sm:$0xff]  }
   0x7   :  { %540 = vmatpush3.bf16.msra.mxu0 %v621_v3  ;;  %610 = vmatpush3.bf16.msra.mxu1 %v621_v3  ;;  %v634_v22 = vld [vmem:[%s869_s0] ss:$8 sps:$4 sm:$0xff]   ;;  %v640_v24 = vld [vmem:[%s869_s0 + $0x14] ss:$8 sps:$4 sm:$0xff]   ;;  %v644_v26 = vld [vmem:[%s869_s0 + $0x10] ss:$8 sps:$4 sm:$0xff]  }
   0x8   :  { %541 = vmatprep.subr.bf16.mxu0 %v622_v4  ;;  %603 = vmatprep.subr.bf16.mxu1 %v622_v4  ;;  %v637_v23 = vld [vmem:[%s869_s0 + $0x40] ss:$8 sps:$4 sm:$0xff]   ;;  %v642_v25 = vld [vmem:[%s869_s0 + $0x54] ss:$8 sps:$4 sm:$0xff]   ;;  %v645_v27 = vld [vmem:[%s869_s0 + $0x50] ss:$8 sps:$4 sm:$0xff]  }
   0x9   :  { %501 = vmatprep.mubr.msk.bf16.mxu1 %vm234_vm1, %v639_v14  ;;  %v646_v28 = vld [vmem:[%s869_s0 + $0x24] ss:$8 sps:$4 sm:$0xff]   ;;  %v650_v30 = vld [vmem:[%s869_s0 + $0x20] ss:$8 sps:$4 sm:$0xff]   ;;  %v652_v32 = vld [vmem:[%s869_s0 + $0x34] ss:$8 sps:$4 sm:$0xff]  }
   0xa   :  { %v648_v29 = vld [vmem:[%s869_s0 + $0x64] ss:$8 sps:$4 sm:$0xff]   ;;  %v651_v31 = vld [vmem:[%s869_s0 + $0x60] ss:$8 sps:$4 sm:$0xff]   ;;  %v654_v33 = vld [vmem:[%s869_s0 + $0x74] ss:$8 sps:$4 sm:$0xff]  }
   0xb   :  { %542 = vmatpush3.bf16.msra.mxu0 %v623_v5  ;;  %611 = vmatpush3.bf16.msra.mxu1 %v623_v5  ;;  %v656_v34 = vld [vmem:[%s869_s0 + $0x30] ss:$8 sps:$4 sm:$0xff]   ;;  %v786_v38 = vld [vmem:[%s870_s2] ss:$0 sm:$0xff] }
   0xc   :  { %543 = vmatprep.subr.bf16.mxu0 %v624_v6  ;;  %604 = vmatprep.subr.bf16.mxu1 %v624_v6  ;;  %v657_v35 = vld [vmem:[%s869_s0 + $0x70] ss:$8 sps:$4 sm:$0xff]  }
   0xf   :  { %544 = vmatpush3.bf16.msra.mxu0 %v625_v7  ;;  %612 = vmatpush3.bf16.msra.mxu1 %v625_v7 }
  0x10   :  { %545 = vmatprep.subr.bf16.mxu0 %v626_v8  ;;  %605 = vmatprep.subr.bf16.mxu1 %v626_v8 }
  0x13   :  { %546 = vmatpush3.bf16.msra.mxu0 %v627_v9  ;;  %613 = vmatpush3.bf16.msra.mxu1 %v627_v9 }
  0x14   :  { %547 = vmatprep.subr.bf16.mxu0 %v628_v10  ;;  %606 = vmatprep.subr.bf16.mxu1 %v628_v10 }
  0x17   :  { %548 = vmatpush3.bf16.msra.mxu0 %v629_v15  ;;  %614 = vmatpush3.bf16.msra.mxu1 %v629_v15 }
  0x18   :  { %549 = vmatprep.subr.bf16.mxu0 %v630_v16  ;;  %607 = vmatprep.subr.bf16.mxu1 %v630_v16 }
  0x1b   :  { %550 = vmatpush3.bf16.msra.mxu0 %v631_v19  ;;  %615 = vmatpush3.bf16.msra.mxu1 %v631_v19 }
  0x1c   :  { %551 = vmatprep.subr.bf16.mxu0 %v264_v20  ;;  %608 = vmatprep.subr.bf16.mxu1 %v264_v20 }
  0x1f   :  { %552 = vmatpush3.bf16.msra.mxu0 %v633_v21  ;;  %616 = vmatpush3.bf16.msra.mxu1 %v633_v21 }
  0x22   :  { %299 = vmatmul.mubr.bf16.vlgmr.msra.gmra.mrb[0].mxu0 %v634_v22  ;;  %331 = vmatmul.mubr.bf16.vlgmr.msra.gmra.mrb[0].mxu1 %v637_v23 }
  0x23   :  { %498 = vmatprep.mubr.msk.bf16.mxu0 %vm234_vm1, %v640_v24  ;;  %502 = vmatprep.mubr.msk.bf16.mxu1 %vm234_vm1, %v642_v25 }
  0x2a   :  { %307 = vmatmul.mubr.bf16.gmra.mrb[4].mxu0 %v644_v26  ;;  %339 = vmatmul.mubr.bf16.gmra.mrb[4].mxu1 %v645_v27 }
  0x2b   :  { %499 = vmatprep.mubr.msk.bf16.mxu0 %vm234_vm1, %v646_v28  ;;  %503 = vmatprep.mubr.msk.bf16.mxu1 %vm234_vm1, %v648_v29 }
  0x32   :  { %315 = vmatmul.mubr.bf16.gmra.mrb[8].mxu0 %v650_v30  ;;  %347 = vmatmul.mubr.bf16.gmra.mrb[8].mxu1 %v651_v31 }
  0x33   :  { %500 = vmatprep.mubr.msk.bf16.mxu0 %vm234_vm1, %v652_v32  ;;  %504 = vmatprep.mubr.msk.bf16.mxu1 %vm234_vm1, %v654_v33 }
  0x3a   :  { %323 = vmatmul.mubr.bf16.gmra.mrb[12].mxu0 %v656_v34  ;;  %355 = vmatmul.mubr.bf16.gmra.mrb[12].mxu1 %v657_v35 }
  0xf5   :  { %v553_v36 = vpop.f32.mrb[0].mxu0  ;;  %v577_v37 = vpop.f32.mrb[0].mxu1 }
  0xf6   :  { %v554_v39 = vpop.f32.mrb[1].mxu0  ;;  %v578_v40 = vpop.f32.mrb[1].mxu1 }
  0xf7   :  { %v555_v41 = vadd.f32 %v554_v39, %v553_v36  ;;  %v579_v42 = vadd.f32 %v578_v40, %v577_v37  ;;  %v556_v43 = vpop.f32.mrb[2].mxu0  ;;  %v580_v44 = vpop.f32.mrb[2].mxu1 }
  0xf8   :  { %v557_v45 = vpop.f32.mrb[3].mxu0  ;;  %v581_v46 = vpop.f32.mrb[3].mxu1 }
  0xf9   :  { %v301_v47 = vadd.f32 %v555_v41, %v786_v38  ;;  %v333_v48 = vadd.f32 %v579_v42, %v786_v38  ;;  %v558_v49 = vadd.f32 %v557_v45, %v556_v43  ;;  %v582_v50 = vadd.f32 %v581_v46, %v580_v44 }
  0xfb   :  { %v363_v51 = vmax.f32 %v301_v47, 0.0  ;;  %v371_v52 = vmax.f32 %v333_v48, 0.0  ;;  %v304_v53 = vadd.f32 %v558_v49, %v786_v38  ;;  %v336_v54 = vadd.f32 %v582_v50, %v786_v38 }
  0xfd   :  { %v521_v55 = vpack.c.bf16 %v363_v51, %v363_v51  ;;  %v529_v56 = vpack.c.bf16 %v371_v52, %v371_v52  ;;  %v364_v57 = vmax.f32 %v304_v53, 0.0  ;;  %v372_v58 = vmax.f32 %v336_v54, 0.0  ;;  %v559_v59 = vpop.f32.mrb[4].mxu0  ;;  %v583_v60 = vpop.f32.mrb[4].mxu1 }
  0xfe   :  { %v560_v61 = vpop.f32.mrb[5].mxu0  ;;  %v584_v62 = vpop.f32.mrb[5].mxu1 }
  0xff   :  { %444 = vst.msk [vmem:[%s871_s3] sm:$0xf] %vm443_vm3, %v521_v55  ;;  %452 = vst.msk [vmem:[%s871_s3 + $0x20] sm:$0xf] %vm443_vm3, %v529_v56  ;;  %v522_v63 = vpack.c.bf16 %v364_v57, %v364_v57  ;;  %v530_v0 = vpack.c.bf16 %v372_v58, %v372_v58  ;;  %v561_v1 = vadd.f32 %v560_v61, %v559_v59  ;;  %v562_v3 = vpop.f32.mrb[6].mxu0  ;;  %v586_v4 = vpop.f32.mrb[6].mxu1 }
 0x100   :  { %v585_v2 = vadd.f32 %v584_v62, %v583_v60  ;;  %v563_v5 = vpop.f32.mrb[7].mxu0  ;;  %v587_v6 = vpop.f32.mrb[7].mxu1 }
 0x101   :  { %445 = vst.msk [vmem:[%s871_s3 + $0x4] sm:$0xf] %vm443_vm3, %v522_v63  ;;  %453 = vst.msk [vmem:[%s871_s3 + $0x24] sm:$0xf] %vm443_vm3, %v530_v0  ;;  %v309_v7 = vadd.f32 %v561_v1, %v786_v38  ;;  %v564_v9 = vadd.f32 %v563_v5, %v562_v3  ;;  %v588_v10 = vadd.f32 %v587_v6, %v586_v4 }
 0x102   :  { %v341_v8 = vadd.f32 %v585_v2, %v786_v38 }
 0x103   :  { %v365_v11 = vmax.f32 %v309_v7, 0.0  ;;  %v312_v13 = vadd.f32 %v564_v9, %v786_v38  ;;  %v344_v14 = vadd.f32 %v588_v10, %v786_v38 }
 0x104   :  { %v373_v12 = vmax.f32 %v341_v8, 0.0 }
 0x105   :  { %v523_v15 = vpack.c.bf16 %v365_v11, %v365_v11  ;;  %v366_v17 = vmax.f32 %v312_v13, 0.0  ;;  %v374_v18 = vmax.f32 %v344_v14, 0.0  ;;  %v565_v19 = vpop.f32.mrb[8].mxu0  ;;  %v589_v20 = vpop.f32.mrb[8].mxu1 }
 0x106   :  { %v531_v16 = vpack.c.bf16 %v373_v12, %v373_v12  ;;  %v566_v21 = vpop.f32.mrb[9].mxu0  ;;  %v590_v22 = vpop.f32.mrb[9].mxu1 }
 0x107   :  { %446 = vst.msk [vmem:[%s871_s3 + $0x8] sm:$0xf] %vm443_vm3, %v523_v15  ;;  %v524_v23 = vpack.c.bf16 %v366_v17, %v366_v17  ;;  %v532_v24 = vpack.c.bf16 %v374_v18, %v374_v18  ;;  %v567_v25 = vadd.f32 %v566_v21, %v565_v19  ;;  %v591_v26 = vadd.f32 %v590_v22, %v589_v20  ;;  %v568_v27 = vpop.f32.mrb[10].mxu0  ;;  %v592_v28 = vpop.f32.mrb[10].mxu1 }
 0x108   :  { %454 = vst.msk [vmem:[%s871_s3 + $0x28] sm:$0xf] %vm443_vm3, %v531_v16  ;;  %v569_v29 = vpop.f32.mrb[11].mxu0  ;;  %v593_v30 = vpop.f32.mrb[11].mxu1 }
 0x109   :  { %447 = vst.msk [vmem:[%s871_s3 + $0xc] sm:$0xf] %vm443_vm3, %v524_v23  ;;  %455 = vst.msk [vmem:[%s871_s3 + $0x2c] sm:$0xf] %vm443_vm3, %v532_v24  ;;  %v317_v31 = vadd.f32 %v567_v25, %v786_v38  ;;  %v349_v32 = vadd.f32 %v591_v26, %v786_v38  ;;  %v570_v33 = vadd.f32 %v569_v29, %v568_v27 }
 0x10a   :  { %v594_v34 = vadd.f32 %v593_v30, %v592_v28 }
 0x10b   :  { %v367_v35 = vmax.f32 %v317_v31, 0.0  ;;  %v375_v36 = vmax.f32 %v349_v32, 0.0  ;;  %v320_v37 = vadd.f32 %v570_v33, %v786_v38 }
 0x10c   :  { %v352_v39 = vadd.f32 %v594_v34, %v786_v38 }
 0x10d   :  { %v525_v40 = vpack.c.bf16 %v367_v35, %v367_v35  ;;  %v533_v41 = vpack.c.bf16 %v375_v36, %v375_v36  ;;  %v368_v42 = vmax.f32 %v320_v37, 0.0  ;;  %v571_v44 = vpop.f32.mrb[12].mxu0  ;;  %v595_v45 = vpop.f32.mrb[12].mxu1 }
 0x10e   :  { %v376_v43 = vmax.f32 %v352_v39, 0.0  ;;  %v572_v46 = vpop.f32.mrb[13].mxu0  ;;  %v596_v47 = vpop.f32.mrb[13].mxu1 }
 0x10f   :  { %448 = vst.msk [vmem:[%s871_s3 + $0x10] sm:$0xf] %vm443_vm3, %v525_v40  ;;  %456 = vst.msk [vmem:[%s871_s3 + $0x30] sm:$0xf] %vm443_vm3, %v533_v41  ;;  %v526_v48 = vpack.c.bf16 %v368_v42, %v368_v42  ;;  %v573_v50 = vadd.f32 %v572_v46, %v571_v44  ;;  %v597_v51 = vadd.f32 %v596_v47, %v595_v45  ;;  %v574_v52 = vpop.f32.mrb[14].mxu0  ;;  %v598_v53 = vpop.f32.mrb[14].mxu1 }
 0x110   :  { %v534_v49 = vpack.c.bf16 %v376_v43, %v376_v43  ;;  %v575_v54 = vpop.f32.mrb[15].mxu0  ;;  %v599_v55 = vpop.f32.mrb[15].mxu1 }
 0x111   :  { %449 = vst.msk [vmem:[%s871_s3 + $0x14] sm:$0xf] %vm443_vm3, %v526_v48  ;;  %v325_v56 = vadd.f32 %v573_v50, %v786_v38  ;;  %v357_v57 = vadd.f32 %v597_v51, %v786_v38  ;;  %v576_v58 = vadd.f32 %v575_v54, %v574_v52  ;;  %v600_v59 = vadd.f32 %v599_v55, %v598_v53 }
 0x112   :  { %457 = vst.msk [vmem:[%s871_s3 + $0x34] sm:$0xf] %vm443_vm3, %v534_v49 }
 0x113   :  { %v369_v60 = vmax.f32 %v325_v56, 0.0  ;;  %v377_v61 = vmax.f32 %v357_v57, 0.0  ;;  %v328_v62 = vadd.f32 %v576_v58, %v786_v38  ;;  %v360_v63 = vadd.f32 %v600_v59, %v786_v38 }
 0x115   :  { %v527_v0 = vpack.c.bf16 %v369_v60, %v369_v60  ;;  %v535_v1 = vpack.c.bf16 %v377_v61, %v377_v61  ;;  %v370_v2 = vmax.f32 %v328_v62, 0.0  ;;  %v378_v3 = vmax.f32 %v360_v63, 0.0 }
 0x117   :  { %450 = vst.msk [vmem:[%s871_s3 + $0x18] sm:$0xf] %vm443_vm3, %v527_v0  ;;  %458 = vst.msk [vmem:[%s871_s3 + $0x38] sm:$0xf] %vm443_vm3, %v535_v1  ;;  %v528_v4 = vpack.c.bf16 %v370_v2, %v370_v2  ;;  %v536_v5 = vpack.c.bf16 %v378_v3, %v378_v3 }
 0x119   :  { %451 = vst.msk [vmem:[%s871_s3 + $0x1c] sm:$0xf] %vm443_vm3, %v528_v4  ;;  %459 = vst.msk [vmem:[%s871_s3 + $0x3c] sm:$0xf] %vm443_vm3, %v536_v5 }

</bundles_post_ra>
